<compile_context>
chip_gen: v5e
topology: v5e:2x2
jax: 0.10.0
libtpu: 0.0.40
codegen_flags: <defaults>
</compile_context>

<pallas_src>
import functools
import math

import jax
import jax.numpy as jnp
from jax.experimental import pallas as pl
from jax.experimental.pallas import tpu as pltpu


# ----------------------------------------------------------------------------
# Pallas kernel: fused (patches @ W) + bias + LeakyReLU(0.1)
# ----------------------------------------------------------------------------

def _downconv_kernel(p_ref, w_ref, b_ref, o_ref):
    # p_ref: (TM, K)    bf16  -- patch rows, batch folded into M
    # w_ref: (K, Cout)  bf16  -- resident across the whole grid
    # b_ref: (1, Cout)  f32
    # o_ref: (TM, Cout) f32
    y = jnp.dot(p_ref[...], w_ref[...], preferred_element_type=jnp.float32)
    y = y + b_ref[...]
    o_ref[...] = jnp.where(y > 0, y, 0.1 * y).astype(o_ref.dtype)


# ----------------------------------------------------------------------------
# Tiling heuristics
# ----------------------------------------------------------------------------

def _round_down_to_8(v):
    return max(8, (v // 8) * 8)


def _pick_tile_m(M, K, Cout, tile_m=None):
    """Pick the M tile: big enough to amortize ~0.35us/step pipeline overhead,
    small enough to stay well inside the default VMEM scoped limit."""
    if tile_m is None:
        bytes_per_row = 2 * K + 4 * Cout            # bf16 patch row in + f32 row out
        tile_m = (3 << 20) // bytes_per_row         # ~3 MiB moved per grid step
        tile_m = max(512, min(8192, tile_m))
    tm = _round_down_to_8(min(tile_m, M))
    # If one tile would cover everything, split in two so the DMA of tile i+1
    # overlaps the compute / writeback of tile i.
    if tm >= M and M >= 1024:
        tm = _round_down_to_8((M + 1) // 2)
    # Prefer a nearby exact divisor of M: avoids a padded HBM copy of `patches`.
    if M % tm:
        lo = max(8, tm - 512)
        for cand in range(tm, lo - 1, -8):
            if M % cand == 0:
                return cand
    return tm


# ----------------------------------------------------------------------------
# Wrapper
# ----------------------------------------------------------------------------

def downsampling_conv_block(x, w, b, *, stride=2, tile_m=None):
    """Forward pass of DownsamplingConvBlock (normalization='none').

    x: (B, D, H, W, Cin)      NDHWC activations (channels-last for TPU lanes)
    w: (Cout, Cin, s, s, s)   PyTorch Conv3d weight layout
    b: (Cout,)                Conv3d bias
    returns: (B, Do, Ho, Wo, Cout) float32
    """
    s = stride
    B, D, H, W, Cin = x.shape
    Cout = w.shape[0]
    Do, Ho, Wo = D // s, H // s, W // s
    # Conv3d with padding=0 floors any spatial remainder.
    x = x[:, :Do * s, :Ho * s, :Wo * s, :]

    K = s * s * s * Cin
    M = B * Do * Ho * Wo

    # Space-to-depth patch extraction (single layout pass, zero duplication):
    # (B, Do, s, Ho, s, Wo, s, Cin) -> (M, K), tap order (kd, kh, kw, c).
    xs = x.astype(jnp.bfloat16)                      # cast first: layout pass writes bf16
    xs = xs.reshape(B, Do, s, Ho, s, Wo, s, Cin)
    xs = xs.transpose(0, 1, 3, 5, 2, 4, 6, 7)
    patches = xs.reshape(M, K)

    # PyTorch weight (Cout, Cin, kd, kh, kw) -> (kd, kh, kw, Cin, Cout) -> (K, Cout)
    # so its flattened index matches the patch tap order exactly.
    wm = jnp.transpose(w, (2, 3, 4, 1, 0)).reshape(K, Cout).astype(jnp.bfloat16)
    bm = b.reshape(1, Cout).astype(jnp.float32)

    tm = _pick_tile_m(M, K, Cout, tile_m)
    grid_m = pl.cdiv(M, tm)
    m_pad = grid_m * tm
    if m_pad != M:                                   # rare: tile snapping usually avoids this
        patches = jnp.pad(patches, ((0, m_pad - M), (0, 0)))

    cost = pl.CostEstimate(
        flops=2 * m_pad * K * Cout,
        transcendentals=0,
        bytes_accessed=m_pad * K * 2 + K * Cout * 2 + Cout * 4 + m_pad * Cout * 4)

    out = pl.pallas_call(
        _downconv_kernel,
        grid=(grid_m,),
        in_specs=[
            pl.BlockSpec((tm, K), lambda i: (i, 0)),       # streamed M-tiles
            pl.BlockSpec((K, Cout), lambda i: (0, 0)),     # weights: fetched once, resident
            pl.BlockSpec((1, Cout), lambda i: (0, 0)),     # bias:    fetched once, resident
        ],
        out_specs=pl.BlockSpec((tm, Cout), lambda i: (i, 0)),
        out_shape=jax.ShapeDtypeStruct((m_pad, Cout), jnp.float32),
        compiler_params=pltpu.CompilerParams(
            dimension_semantics=("parallel",)),            # independent M tiles -> megacore
        cost_estimate=cost,
    )(patches, wm, bm)

    return out[:M].reshape(B, Do, Ho, Wo, Cout)


# ----------------------------------------------------------------------------
# Main
# ----------------------------------------------------------------------------

if __name__ == "__main__":
    key = jax.random.PRNGKey(0)
    kx, kw, kb = jax.random.split(key, 3)

    B, Cin, Cout, D, stride = 2, 16, 32, 16, 2

    x = jax.random.normal(kx, (B, D, D, D, Cin), jnp.float32)
    w = jax.random.normal(kw, (Cout, Cin, stride, stride, stride), jnp.float32)
    w = w * (1.0 / math.sqrt(stride ** 3 * Cin))
    b = jax.random.normal(kb, (Cout,), jnp.float32) * 0.01

    fwd = jax.jit(functools.partial(downsampling_conv_block, stride=stride))
    out = jax.block_until_ready(fwd(x, w, b))

    assert out.shape == (B, D // stride, D // stride, D // stride, Cout), out.shape
    assert bool(jnp.all(jnp.isfinite(out)))

    # Reference: XLA conv on the same bf16-cast operands, f32 accumulation.
    ref = jax.lax.conv_general_dilated(
        x.astype(jnp.bfloat16),
        jnp.transpose(w, (2, 3, 4, 1, 0)).astype(jnp.bfloat16),
        window_strides=(stride,) * 3, padding="VALID",
        dimension_numbers=("NDHWC", "DHWIO", "NDHWC"),
        preferred_element_type=jnp.float32)
    ref = ref + b.reshape(1, 1, 1, 1, Cout)
    ref = jnp.where(ref > 0, ref, 0.1 * ref)
    max_err = float(jnp.max(jnp.abs(out - ref)))
    assert bool(jnp.allclose(out, ref, atol=2e-2, rtol=2e-2)), max_err

    print("KERNEL_OK")
</pallas_src>

<mosaic_0001>
module attributes {stable_mosaic.version = 11 : i64} {
  func.func @_downconv_kernel(%arg0: i32, %arg1: memref<512x128xbf16, #tpu.memory_space<vmem>>, %arg2: memref<128x32xbf16, #tpu.memory_space<vmem>>, %arg3: memref<1x32xf32, #tpu.memory_space<vmem>>, %arg4: memref<512x32xf32, #tpu.memory_space<vmem>>) attributes {dimension_semantics = [#tpu.dimension_semantics<parallel>], iteration_bounds = array<i64: 2>, scalar_prefetch = 0 : i64, scratch_operands = 0 : i64, tpu.core_type = #tpu.core_type<tc>, window_params = [{transform_indices = @transform_0, window_bounds = array<i64: 512, 128>}, {pipeline_mode = #tpu.pipeline_mode<synchronous>, transform_indices = @transform_1, window_bounds = array<i64: 128, 32>}, {pipeline_mode = #tpu.pipeline_mode<synchronous>, transform_indices = @transform_2, window_bounds = array<i64: 1, 32>}, {transform_indices = @transform_3, window_bounds = array<i64: 512, 32>}]} {
    %c0 = arith.constant 0 : index
    %c0_0 = arith.constant 0 : index
    %0 = vector.load %arg1[%c0, %c0_0] : memref<512x128xbf16, #tpu.memory_space<vmem>>, vector<512x128xbf16>
    %c0_1 = arith.constant 0 : index
    %c0_2 = arith.constant 0 : index
    %1 = vector.load %arg2[%c0_1, %c0_2] : memref<128x32xbf16, #tpu.memory_space<vmem>>, vector<128x32xbf16>
    %cst = arith.constant dense<0.000000e+00> : vector<512x32xf32>
    %2 = tpu.matmul %0, %1, %cst {dimension_numbers = #tpu.dot_dimension_numbers<[1], [0], [0], [1], [0, 0, 1, 1], [], []>} : vector<512x128xbf16>, vector<128x32xbf16>, vector<512x32xf32> -> vector<512x32xf32>
    %c0_3 = arith.constant 0 : index
    %c0_4 = arith.constant 0 : index
    %3 = vector.load %arg3[%c0_3, %c0_4] : memref<1x32xf32, #tpu.memory_space<vmem>>, vector<1x32xf32>
    %4 = vector.broadcast %3 : vector<1x32xf32> to vector<512x32xf32>
    %5 = arith.addf %2, %4 : vector<512x32xf32>
    %cst_5 = arith.constant 0.000000e+00 : f32
    %6 = vector.broadcast %cst_5 : f32 to vector<512x32xf32>
    %7 = arith.cmpf ogt, %5, %6 : vector<512x32xf32>
    %cst_6 = arith.constant 1.000000e-01 : f32
    %8 = vector.broadcast %cst_6 : f32 to vector<512x32xf32>
    %9 = arith.mulf %8, %5 : vector<512x32xf32>
    %10 = arith.select %7, %5, %9 : vector<512x32xi1>, vector<512x32xf32>
    %c0_7 = arith.constant 0 : index
    %c0_8 = arith.constant 0 : index
    %11 = vector.load %arg4[%c0_7, %c0_8] : memref<512x32xf32, #tpu.memory_space<vmem>>, vector<512x32xf32>
    tpu.vector_store %arg4[%c0_7, %c0_8], %10 {strides = array<i32>} : memref<512x32xf32, #tpu.memory_space<vmem>>, vector<512x32xf32>,
    return
  }
  func.func @transform_0(%arg0: i32) -> (i32, i32) {
    %c0_i32 = arith.constant 0 : i32
    %c0_i32_0 = arith.constant 0 : i32
    return %arg0, %c0_i32 : i32, i32
  }
  func.func @transform_1(%arg0: i32) -> (i32, i32) {
    %c0_i32 = arith.constant 0 : i32
    %c0_i32_0 = arith.constant 0 : i32
    %c0_i32_1 = arith.constant 0 : i32
    return %c0_i32, %c0_i32_0 : i32, i32
  }
  func.func @transform_2(%arg0: i32) -> (i32, i32) {
    %c0_i32 = arith.constant 0 : i32
    %c0_i32_0 = arith.constant 0 : i32
    %c0_i32_1 = arith.constant 0 : i32
    return %c0_i32, %c0_i32_0 : i32, i32
  }
  func.func @transform_3(%arg0: i32) -> (i32, i32) {
    %c0_i32 = arith.constant 0 : i32
    %c0_i32_0 = arith.constant 0 : i32
    return %arg0, %c0_i32 : i32, i32
  }
}

</mosaic_0001>

<bundles_post_ra>
// kernel: downsampling_conv_block.1
= control target key start
LH: loop header
LB: loop body
LE: loop exit
PB: predicated region body
PF: predicated region fallthrough
CT: control target
= control target key end

     0   :  { %8 = vsyncpa [#allocation3], 0  ;;  %s1711_s0 = inlined_call_operand.vmem [shape: bf16[1024,128], index: 0, kind: input, shape index: {}]   ;;  %s1712_s1 = inlined_call_operand.vmem [shape: bf16[128,32], index: 1, kind: input, shape index: {}]   ;;  %s1713_s2 = inlined_call_operand.vmem [shape: f32[1,32], index: 2, kind: input, shape index: {}]   ;;  %s1714_s3 = inlined_call_operand.hbm [shape: f32[1024,32], index: 3, kind: output, shape index: {}]  }
   0x1   :  { %10 = vsyncpa [#allocation3 + $0x1], 0  ;;  %s1365_s12 = smov 0   ;;  %s1367_s13 = smov 0  }
   0x2   :  { %s1369_s14 = smov 0   ;;  %s1371_s15 = smov 0  }
   0x3 LB: > { %s1386_s16 = sadd.s32 4294967295, %s1341_s15   ;;  %s1000_s17 = sadd.s32 4294967294, %s1341_s15   ;;  %s1341_s15 = sphi %s1371_s15, %s1720_s15   ;;  %s1337_s14 = sphi %s1369_s14, %s1719_s14   ;;  %s1333_s13 = sphi %s1367_s13, %s1718_s13   ;;  %s1329_s12 = sphi %s1365_s12, %s1717_s12  }
   0x4   : > { %s1390_s18 = sadd.s32 1, %s1341_s15   ;;  %s91_s19 = sadd.s32 1, %s1337_s14 }
   0x5   : > { %s88_s20 = ssub.s32 %s1341_s15, %s1390_s18  ;;  %p101_p0 = scmp.ne.s32.totalorder %s1337_s14, %s1333_s13 }
   0x6   : > { %p89_p1 = scmp.eq.s32.totalorder %s88_s20, 0  ;;  %p102_p2 = scmp.eq.s32.totalorder %s1386_s16, 1 }
   0x7   : > { %p107_p3 = scmp.ne.s32.totalorder %s1333_s13, %s1329_s12  ;;  %p108_p4 = scmp.eq.s32.totalorder %s1000_s17, 1 }
   0x8   : > { %s1401_s21 = scalar_select %p89_p1, %s1337_s14, %s91_s19  }
   0x9   : > { %p1403_p5 = por %p102_p2, %p101_p0  ;;  %p1407_p6 = por %p108_p4, %p107_p3 }
   0xa   : > { %p1003_p7 = scmp.ge.s32.totalorder %s1341_s15, 1  ;;  %p141_p8 = scmp.lt.s32.totalorder %s1341_s15, 3 }
   0xc   : > { %p142_p9 = pnand %p1003_p7, %p141_p8 }
   0xd   : > { %s1005_s5 = sshll.u32 (!%p142_p9), %s1386_s16, 6  ;;  %s162_s27 = sand.u32 (!%p142_p9), 1, %s1333_s13  }
   0xe   : > { %145 = sbr.rel (%p142_p9) target bundleno = 314 (0x13a), region = 32  ;;  %p166_p10 = scmp.lt.s32.totalorder (!%p142_p9), %s1005_s5, 127 }
   0xf   : > { %s1004_s30 = sshll.u32 (!%p142_p9), %s162_s27, 9  ;;  %s923_s10 = scalar_lea.sflag (!%p142_p9), [#allocation3], %s162_s27 }
  0x10   : > { %s1485_s4 = scalar_lea.vmem (!%p142_p9), [#allocation2], %s1004_s30  ;;  %s1299_s24 = scalar_lea.hbm (!%p142_p9), %s1714_s3, 1024 }
  0x11   : > { %s935_s8 = sshll.u32 (!%p142_p9), %s1485_s4, 4  ;;  %s936_s8 = int_to_ptr.vmem [resolvable:$true] %s935_s8 }
  0x13   : > { %v1211_v0 = vld [vmem:[%s1712_s1 + $0x38] sm:$0xff]  ;;  %v1210_v1 = vld [vmem:[%s1712_s1 + $0x30] sm:$0xff]  ;;  %v1209_v2 = vld [vmem:[%s1712_s1 + $0x28] sm:$0xff]  ;;  %s1722_s5 = smov (!%p166_p10, %s1005_s5), 127  ;;  %vm857_vm0 = vcmask 261120  }
  0x14   : > { %496 = vmatpush.bf16.msra.mxu0 %v1211_v0  ;;  %1213 = vmatpush.bf16.msra.mxu1 %v1211_v0  ;;  %v1208_v3 = vld [vmem:[%s1712_s1 + $0x20] sm:$0xff]  ;;  %v1207_v4 = vld [vmem:[%s1712_s1 + $0x18] sm:$0xff]  ;;  %v1206_v5 = vld [vmem:[%s1712_s1 + $0x10] sm:$0xff]  ;;  %s1006_s17 = sshll.u32 %s1722_s5, 2  ;;  %s1212_s5 = sshll.u32 %s1386_s16, 9 }
  0x15   : > { %1214 = vmatpush.bf16.msra.mxu2 %v1211_v0  ;;  %1215 = vmatpush.bf16.msra.mxu3 %v1211_v0  ;;  %v1205_v6 = vld [vmem:[%s1712_s1 + $0x8] sm:$0xff]  ;;  %v1204_v7 = vld [vmem:[%s1712_s1] sm:$0xff]  ;;  %s1441_s26 = scalar_lea.vmem %s1711_s0, %s1006_s17  ;;  %s934_s7 = scalar_lea.hbm %s1714_s3, %s1212_s5 }
  0x16   : > { %v1172_v8 = vld [vmem:[%s1441_s26] sm:$0xff]  ;;  %v1173_v12 = vld [vmem:[%s1441_s26 + $0x8] sm:$0xff]  ;;  %v1174_v16 = vld [vmem:[%s1441_s26 + $0x10] sm:$0xff]  ;;  %s937_s9 = sshll.u32 %s934_s7, 4  ;;  %s938_s9 = int_to_ptr.hbm [resolvable:$true] %s937_s9 }
  0x17   : > { %v1180_v9 = vld [vmem:[%s1441_s26 + $0x40] sm:$0xff]  ;;  %v1181_v13 = vld [vmem:[%s1441_s26 + $0x48] sm:$0xff]  ;;  %v1182_v17 = vld [vmem:[%s1441_s26 + $0x50] sm:$0xff]  ;;  %s1293_s11 = sshra.s32 %s938_s9, 4  ;;  %s1294_s11 = int_to_ptr.hbm [resolvable:$true] %s1293_s11 }
  0x18   : > { %497 = vmatpush.bf16.msra.mxu0 %v1210_v1  ;;  %1216 = vmatpush.bf16.msra.mxu1 %v1210_v1  ;;  %v1188_v10 = vld [vmem:[%s1441_s26 + $0x80] sm:$0xff]  ;;  %v1189_v14 = vld [vmem:[%s1441_s26 + $0x88] sm:$0xff]  ;;  %v1190_v18 = vld [vmem:[%s1441_s26 + $0x90] sm:$0xff]  ;;  %s1295_s17 = scalar_lea.hbm %s1294_s11, 512  ;;  %p1300_p0 = scmp.lt.s32.totalorder %s1294_s11, %s1714_s3 }
  0x19   : > { %1217 = vmatpush.bf16.msra.mxu2 %v1210_v1  ;;  %1218 = vmatpush.bf16.msra.mxu3 %v1210_v1  ;;  %v1196_v11 = vld [vmem:[%s1441_s26 + $0xc0] sm:$0xff]  ;;  %v1197_v15 = vld [vmem:[%s1441_s26 + $0xc8] sm:$0xff]  ;;  %v1198_v19 = vld [vmem:[%s1441_s26 + $0xd0] sm:$0xff]  ;;  %p1296_p11 = scmp.ne.s32.totalorder %s1294_s11, %s1295_s17  ;;  %p1301_p1 = scmp.lt.s32.totalorder %s1299_s24, %s1295_s17 }
  0x1a   : > { %v1175_v20 = vld [vmem:[%s1441_s26 + $0x18] sm:$0xff]  ;;  %v1176_v24 = vld [vmem:[%s1441_s26 + $0x20] sm:$0xff]  ;;  %v1177_v28 = vld [vmem:[%s1441_s26 + $0x28] sm:$0xff] }
  0x1b   : > { %v1183_v21 = vld [vmem:[%s1441_s26 + $0x58] sm:$0xff]  ;;  %v1184_v25 = vld [vmem:[%s1441_s26 + $0x60] sm:$0xff]  ;;  %v1185_v29 = vld [vmem:[%s1441_s26 + $0x68] sm:$0xff]  ;;  %p1297_p12 = pnand %p1296_p11, %p1403_p5  ;;  %p1302_p2 = por %p1301_p1, %p1300_p0 }
  0x1c   : > { %498 = vmatpush.bf16.msra.mxu0 %v1209_v2  ;;  %1219 = vmatpush.bf16.msra.mxu1 %v1209_v2  ;;  %v1191_v22 = vld [vmem:[%s1441_s26 + $0x98] sm:$0xff]  ;;  %v1192_v26 = vld [vmem:[%s1441_s26 + $0xa0] sm:$0xff]  ;;  %v1193_v30 = vld [vmem:[%s1441_s26 + $0xa8] sm:$0xff] }
  0x1d   : > { %1220 = vmatpush.bf16.msra.mxu2 %v1209_v2  ;;  %1221 = vmatpush.bf16.msra.mxu3 %v1209_v2  ;;  %v1199_v23 = vld [vmem:[%s1441_s26 + $0xd8] sm:$0xff]  ;;  %v1200_v27 = vld [vmem:[%s1441_s26 + $0xe0] sm:$0xff]  ;;  %v1201_v31 = vld [vmem:[%s1441_s26 + $0xe8] sm:$0xff]  ;;  %p1298_p13 = pneg %p1297_p12 }
  0x1e   : > { %v1178_v32 = vld [vmem:[%s1441_s26 + $0x30] sm:$0xff]  ;;  %v1179_v36 = vld [vmem:[%s1441_s26 + $0x38] sm:$0xff]  ;;  %v1479_v40 = vld [vmem:[%s1713_s2] ss:$0 sm:$0xff] }
  0x1f   : > { %v1186_v33 = vld [vmem:[%s1441_s26 + $0x70] sm:$0xff]  ;;  %v1187_v37 = vld [vmem:[%s1441_s26 + $0x78] sm:$0xff]  ;;  %p1303_p3 = pnand %p1302_p2, %p1298_p13 }
  0x20   : > { %499 = vmatpush.bf16.msra.mxu0 %v1208_v3  ;;  %1222 = vmatpush.bf16.msra.mxu1 %v1208_v3  ;;  %v1194_v34 = vld [vmem:[%s1441_s26 + $0xb0] sm:$0xff]  ;;  %v1195_v38 = vld [vmem:[%s1441_s26 + $0xb8] sm:$0xff] }
  0x21   : > { %1223 = vmatpush.bf16.msra.mxu2 %v1208_v3  ;;  %1224 = vmatpush.bf16.msra.mxu3 %v1208_v3  ;;  %v1202_v35 = vld [vmem:[%s1441_s26 + $0xf0] sm:$0xff]  ;;  %v1203_v39 = vld [vmem:[%s1441_s26 + $0xf8] sm:$0xff] }
  0x24   : > { %500 = vmatpush.bf16.msra.mxu0 %v1207_v4  ;;  %1225 = vmatpush.bf16.msra.mxu1 %v1207_v4 }
  0x25   : > { %1226 = vmatpush.bf16.msra.mxu2 %v1207_v4  ;;  %1227 = vmatpush.bf16.msra.mxu3 %v1207_v4 }
  0x28   : > { %501 = vmatpush.bf16.msra.mxu0 %v1206_v5  ;;  %1228 = vmatpush.bf16.msra.mxu1 %v1206_v5 }
  0x29   : > { %1229 = vmatpush.bf16.msra.mxu2 %v1206_v5  ;;  %1230 = vmatpush.bf16.msra.mxu3 %v1206_v5 }
  0x2c   : > { %502 = vmatpush.bf16.msra.mxu0 %v1205_v6  ;;  %1231 = vmatpush.bf16.msra.mxu1 %v1205_v6 }
  0x2d   : > { %1232 = vmatpush.bf16.msra.mxu2 %v1205_v6  ;;  %1233 = vmatpush.bf16.msra.mxu3 %v1205_v6 }
  0x30   : > { %503 = vmatpush.bf16.msra.mxu0 %v1204_v7  ;;  %1234 = vmatpush.bf16.msra.mxu1 %v1204_v7 }
  0x31   : > { %1235 = vmatpush.bf16.msra.mxu2 %v1204_v7  ;;  %1236 = vmatpush.bf16.msra.mxu3 %v1204_v7 }
  0x33   : > { %504 = vmatmul.bf16.vlgmr.msra.gmra.mxu0 %v1172_v8  ;;  %544 = vmatmul.bf16.vlgmr.msra.gmra.mxu1 %v1180_v9 }
  0x34   : > { %584 = vmatmul.bf16.vlgmr.msra.gmra.mxu2 %v1188_v10  ;;  %624 = vmatmul.bf16.vlgmr.msra.gmra.mxu3 %v1196_v11 }
  0x43   : > { %509 = vmatmul.bf16.gmra.mxu0 %v1173_v12  ;;  %549 = vmatmul.bf16.gmra.mxu1 %v1181_v13 }
  0x44   : > { %589 = vmatmul.bf16.gmra.mxu2 %v1189_v14  ;;  %629 = vmatmul.bf16.gmra.mxu3 %v1197_v15 }
  0x53   : > { %514 = vmatmul.bf16.gmra.mxu0 %v1174_v16  ;;  %554 = vmatmul.bf16.gmra.mxu1 %v1182_v17 }
  0x54   : > { %594 = vmatmul.bf16.gmra.mxu2 %v1190_v18  ;;  %634 = vmatmul.bf16.gmra.mxu3 %v1198_v19 }
  0x63   : > { %519 = vmatmul.bf16.gmra.mxu0 %v1175_v20  ;;  %559 = vmatmul.bf16.gmra.mxu1 %v1183_v21 }
  0x64   : > { %599 = vmatmul.bf16.gmra.mxu2 %v1191_v22  ;;  %639 = vmatmul.bf16.gmra.mxu3 %v1199_v23 }
  0x73   : > { %524 = vmatmul.bf16.gmra.mxu0 %v1176_v24  ;;  %564 = vmatmul.bf16.gmra.mxu1 %v1184_v25 }
  0x74   : > { %604 = vmatmul.bf16.gmra.mxu2 %v1192_v26  ;;  %644 = vmatmul.bf16.gmra.mxu3 %v1200_v27 }
  0x83   : > { %529 = vmatmul.bf16.gmra.mxu0 %v1177_v28  ;;  %569 = vmatmul.bf16.gmra.mxu1 %v1185_v29 }
  0x84   : > { %609 = vmatmul.bf16.gmra.mxu2 %v1193_v30  ;;  %649 = vmatmul.bf16.gmra.mxu3 %v1201_v31 }
  0x93   : > { %534 = vmatmul.bf16.gmra.mxu0 %v1178_v32  ;;  %574 = vmatmul.bf16.gmra.mxu1 %v1186_v33 }
  0x94   : > { %614 = vmatmul.bf16.gmra.mxu2 %v1194_v34  ;;  %654 = vmatmul.bf16.gmra.mxu3 %v1202_v35 }
  0xa3   : > { %539 = vmatmul.bf16.gmra.mxu0 %v1179_v36  ;;  %579 = vmatmul.bf16.gmra.mxu1 %v1187_v37 }
  0xa4   : > { %619 = vmatmul.bf16.gmra.mxu2 %v1195_v38  ;;  %659 = vmatmul.bf16.gmra.mxu3 %v1203_v39 }
  0xb0   : > { %v505_v41 = vpop.f32.mrf.mxu0  ;;  %v545_v42 = vpop.f32.mrf.mxu1 }
  0xb1   : > { %v506_v43 = vadd.f32 %v1479_v40, %v505_v41  ;;  %v546_v44 = vadd.f32 %v1479_v40, %v545_v42 }
  0xb3   : > { %vm665_vm1 = vcmp.gt.f32.partialorder %v506_v43, 0.0  ;;  %v729_v45 = vmul.f32 0.1, %v506_v43  ;;  %vm681_vm2 = vcmp.gt.f32.partialorder %v546_v44, 0.0  ;;  %v745_v46 = vmul.f32 0.1, %v546_v44 }
  0xb5   : > { %v793_v47 = vsel %vm665_vm1, %v506_v43, %v729_v45  ;;  %v809_v48 = vsel %vm681_vm2, %v546_v44, %v745_v46 }
  0xb6   : > { %858 = vst.msk [vmem:[%s1485_s4] sm:$0xff] %vm857_vm0, %v793_v47 }
  0xb7   : > { %874 = vst.msk [vmem:[%s1485_s4 + $0x80] sm:$0xff] %vm857_vm0, %v809_v48  ;;  %v585_v49 = vpop.f32.mrf.mxu2  ;;  %v625_v50 = vpop.f32.mrf.mxu3 }
  0xb8   : > { %v586_v51 = vadd.f32 %v1479_v40, %v585_v49  ;;  %v626_v52 = vadd.f32 %v1479_v40, %v625_v50  ;;  %v507_v53 = vpop.f32.mrf.mxu0  ;;  %v547_v54 = vpop.f32.mrf.mxu1 }
  0xb9   : > { %v508_v55 = vadd.f32 %v1479_v40, %v507_v53  ;;  %v548_v56 = vadd.f32 %v1479_v40, %v547_v54 }
  0xba   : > { %vm697_vm3 = vcmp.gt.f32.partialorder %v586_v51, 0.0  ;;  %v761_v57 = vmul.f32 0.1, %v586_v51  ;;  %vm713_vm4 = vcmp.gt.f32.partialorder %v626_v52, 0.0  ;;  %v777_v58 = vmul.f32 0.1, %v626_v52 }
  0xbb   : > { %vm666_vm5 = vcmp.gt.f32.partialorder %v508_v55, 0.0  ;;  %v730_v59 = vmul.f32 0.1, %v508_v55  ;;  %vm682_vm6 = vcmp.gt.f32.partialorder %v548_v56, 0.0  ;;  %v746_v60 = vmul.f32 0.1, %v548_v56 }
  0xbc   : > { %v825_v61 = vsel %vm697_vm3, %v586_v51, %v761_v57  ;;  %v841_v62 = vsel %vm713_vm4, %v626_v52, %v777_v58 }
  0xbd   : > { %890 = vst.msk [vmem:[%s1485_s4 + $0x100] sm:$0xff] %vm857_vm0, %v825_v61  ;;  %v794_v63 = vsel %vm666_vm5, %v508_v55, %v730_v59  ;;  %v810_v0 = vsel %vm682_vm6, %v548_v56, %v746_v60 }
  0xbe   : > { %906 = vst.msk [vmem:[%s1485_s4 + $0x180] sm:$0xff] %vm857_vm0, %v841_v62 }
  0xbf   : > { %859 = vst.msk [vmem:[%s1485_s4 + $0x8] sm:$0xff] %vm857_vm0, %v794_v63  ;;  %v587_v1 = vpop.f32.mrf.mxu2  ;;  %v627_v2 = vpop.f32.mrf.mxu3 }
  0xc0   : > { %875 = vst.msk [vmem:[%s1485_s4 + $0x88] sm:$0xff] %vm857_vm0, %v810_v0  ;;  %v588_v3 = vadd.f32 %v1479_v40, %v587_v1  ;;  %v628_v4 = vadd.f32 %v1479_v40, %v627_v2  ;;  %v510_v5 = vpop.f32.mrf.mxu0  ;;  %v550_v6 = vpop.f32.mrf.mxu1 }
  0xc1   : > { %v511_v7 = vadd.f32 %v1479_v40, %v510_v5  ;;  %v551_v8 = vadd.f32 %v1479_v40, %v550_v6 }
  0xc2   : > { %vm698_vm7 = vcmp.gt.f32.partialorder %v588_v3, 0.0  ;;  %v762_v9 = vmul.f32 0.1, %v588_v3  ;;  %vm714_vm8 = vcmp.gt.f32.partialorder %v628_v4, 0.0  ;;  %v778_v10 = vmul.f32 0.1, %v628_v4 }
  0xc3   : > { %vm667_vm9 = vcmp.gt.f32.partialorder %v511_v7, 0.0  ;;  %v731_v11 = vmul.f32 0.1, %v511_v7  ;;  %vm683_vm10 = vcmp.gt.f32.partialorder %v551_v8, 0.0  ;;  %v747_v12 = vmul.f32 0.1, %v551_v8 }
  0xc4   : > { %v826_v13 = vsel %vm698_vm7, %v588_v3, %v762_v9  ;;  %v842_v14 = vsel %vm714_vm8, %v628_v4, %v778_v10 }
  0xc5   : > { %891 = vst.msk [vmem:[%s1485_s4 + $0x108] sm:$0xff] %vm857_vm0, %v826_v13  ;;  %v795_v15 = vsel %vm667_vm9, %v511_v7, %v731_v11  ;;  %v811_v16 = vsel %vm683_vm10, %v551_v8, %v747_v12 }
  0xc6   : > { %907 = vst.msk [vmem:[%s1485_s4 + $0x188] sm:$0xff] %vm857_vm0, %v842_v14 }
  0xc7   : > { %860 = vst.msk [vmem:[%s1485_s4 + $0x10] sm:$0xff] %vm857_vm0, %v795_v15  ;;  %v590_v17 = vpop.f32.mrf.mxu2  ;;  %v630_v18 = vpop.f32.mrf.mxu3 }
  0xc8   : > { %876 = vst.msk [vmem:[%s1485_s4 + $0x90] sm:$0xff] %vm857_vm0, %v811_v16  ;;  %v591_v19 = vadd.f32 %v1479_v40, %v590_v17  ;;  %v631_v20 = vadd.f32 %v1479_v40, %v630_v18  ;;  %v512_v21 = vpop.f32.mrf.mxu0  ;;  %v552_v22 = vpop.f32.mrf.mxu1 }
  0xc9   : > { %v513_v23 = vadd.f32 %v1479_v40, %v512_v21  ;;  %v553_v24 = vadd.f32 %v1479_v40, %v552_v22 }
  0xca   : > { %vm699_vm11 = vcmp.gt.f32.partialorder %v591_v19, 0.0  ;;  %v763_v25 = vmul.f32 0.1, %v591_v19  ;;  %vm715_vm12 = vcmp.gt.f32.partialorder %v631_v20, 0.0  ;;  %v779_v26 = vmul.f32 0.1, %v631_v20 }
  0xcb   : > { %vm668_vm13 = vcmp.gt.f32.partialorder %v513_v23, 0.0  ;;  %v732_v27 = vmul.f32 0.1, %v513_v23  ;;  %vm684_vm14 = vcmp.gt.f32.partialorder %v553_v24, 0.0  ;;  %v748_v28 = vmul.f32 0.1, %v553_v24 }
  0xcc   : > { %v827_v29 = vsel %vm699_vm11, %v591_v19, %v763_v25  ;;  %v843_v30 = vsel %vm715_vm12, %v631_v20, %v779_v26 }
  0xcd   : > { %892 = vst.msk [vmem:[%s1485_s4 + $0x110] sm:$0xff] %vm857_vm0, %v827_v29  ;;  %v796_v31 = vsel %vm668_vm13, %v513_v23, %v732_v27  ;;  %v812_v32 = vsel %vm684_vm14, %v553_v24, %v748_v28 }
  0xce   : > { %908 = vst.msk [vmem:[%s1485_s4 + $0x190] sm:$0xff] %vm857_vm0, %v843_v30 }
  0xcf   : > { %861 = vst.msk [vmem:[%s1485_s4 + $0x18] sm:$0xff] %vm857_vm0, %v796_v31  ;;  %v592_v33 = vpop.f32.mrf.mxu2  ;;  %v632_v34 = vpop.f32.mrf.mxu3 }
  0xd0   : > { %877 = vst.msk [vmem:[%s1485_s4 + $0x98] sm:$0xff] %vm857_vm0, %v812_v32  ;;  %v593_v35 = vadd.f32 %v1479_v40, %v592_v33  ;;  %v633_v36 = vadd.f32 %v1479_v40, %v632_v34  ;;  %v515_v37 = vpop.f32.mrf.mxu0  ;;  %v555_v38 = vpop.f32.mrf.mxu1 }
  0xd1   : > { %v516_v39 = vadd.f32 %v1479_v40, %v515_v37  ;;  %v556_v41 = vadd.f32 %v1479_v40, %v555_v38 }
  0xd2   : > { %vm700_vm15 = vcmp.gt.f32.partialorder %v593_v35, 0.0  ;;  %v764_v42 = vmul.f32 0.1, %v593_v35  ;;  %vm716_vm1 = vcmp.gt.f32.partialorder %v633_v36, 0.0  ;;  %v780_v43 = vmul.f32 0.1, %v633_v36 }
  0xd3   : > { %vm669_vm2 = vcmp.gt.f32.partialorder %v516_v39, 0.0  ;;  %v733_v44 = vmul.f32 0.1, %v516_v39  ;;  %vm685_vm3 = vcmp.gt.f32.partialorder %v556_v41, 0.0  ;;  %v749_v45 = vmul.f32 0.1, %v556_v41 }
  0xd4   : > { %v828_v46 = vsel %vm700_vm15, %v593_v35, %v764_v42  ;;  %v844_v47 = vsel %vm716_vm1, %v633_v36, %v780_v43 }
  0xd5   : > { %893 = vst.msk [vmem:[%s1485_s4 + $0x118] sm:$0xff] %vm857_vm0, %v828_v46  ;;  %v797_v48 = vsel %vm669_vm2, %v516_v39, %v733_v44  ;;  %v813_v49 = vsel %vm685_vm3, %v556_v41, %v749_v45 }
  0xd6   : > { %909 = vst.msk [vmem:[%s1485_s4 + $0x198] sm:$0xff] %vm857_vm0, %v844_v47 }
  0xd7   : > { %862 = vst.msk [vmem:[%s1485_s4 + $0x20] sm:$0xff] %vm857_vm0, %v797_v48  ;;  %v595_v50 = vpop.f32.mrf.mxu2  ;;  %v635_v51 = vpop.f32.mrf.mxu3 }
  0xd8   : > { %878 = vst.msk [vmem:[%s1485_s4 + $0xa0] sm:$0xff] %vm857_vm0, %v813_v49  ;;  %v596_v52 = vadd.f32 %v1479_v40, %v595_v50  ;;  %v636_v53 = vadd.f32 %v1479_v40, %v635_v51  ;;  %v517_v54 = vpop.f32.mrf.mxu0  ;;  %v557_v55 = vpop.f32.mrf.mxu1 }
  0xd9   : > { %v518_v56 = vadd.f32 %v1479_v40, %v517_v54  ;;  %v558_v57 = vadd.f32 %v1479_v40, %v557_v55 }
  0xda   : > { %vm701_vm4 = vcmp.gt.f32.partialorder %v596_v52, 0.0  ;;  %v765_v58 = vmul.f32 0.1, %v596_v52  ;;  %vm717_vm5 = vcmp.gt.f32.partialorder %v636_v53, 0.0  ;;  %v781_v59 = vmul.f32 0.1, %v636_v53 }
  0xdb   : > { %vm670_vm6 = vcmp.gt.f32.partialorder %v518_v56, 0.0  ;;  %v734_v60 = vmul.f32 0.1, %v518_v56  ;;  %vm686_vm7 = vcmp.gt.f32.partialorder %v558_v57, 0.0  ;;  %v750_v61 = vmul.f32 0.1, %v558_v57 }
  0xdc   : > { %v829_v62 = vsel %vm701_vm4, %v596_v52, %v765_v58  ;;  %v845_v63 = vsel %vm717_vm5, %v636_v53, %v781_v59 }
  0xdd   : > { %894 = vst.msk [vmem:[%s1485_s4 + $0x120] sm:$0xff] %vm857_vm0, %v829_v62  ;;  %v798_v0 = vsel %vm670_vm6, %v518_v56, %v734_v60  ;;  %v814_v1 = vsel %vm686_vm7, %v558_v57, %v750_v61 }
  0xde   : > { %910 = vst.msk [vmem:[%s1485_s4 + $0x1a0] sm:$0xff] %vm857_vm0, %v845_v63 }
  0xdf   : > { %863 = vst.msk [vmem:[%s1485_s4 + $0x28] sm:$0xff] %vm857_vm0, %v798_v0  ;;  %v597_v2 = vpop.f32.mrf.mxu2  ;;  %v637_v3 = vpop.f32.mrf.mxu3 }
  0xe0   : > { %879 = vst.msk [vmem:[%s1485_s4 + $0xa8] sm:$0xff] %vm857_vm0, %v814_v1  ;;  %v598_v4 = vadd.f32 %v1479_v40, %v597_v2  ;;  %v638_v5 = vadd.f32 %v1479_v40, %v637_v3  ;;  %v520_v6 = vpop.f32.mrf.mxu0  ;;  %v560_v7 = vpop.f32.mrf.mxu1 }
  0xe1   : > { %v521_v8 = vadd.f32 %v1479_v40, %v520_v6  ;;  %v561_v9 = vadd.f32 %v1479_v40, %v560_v7 }
  0xe2   : > { %vm702_vm8 = vcmp.gt.f32.partialorder %v598_v4, 0.0  ;;  %v766_v10 = vmul.f32 0.1, %v598_v4  ;;  %vm718_vm9 = vcmp.gt.f32.partialorder %v638_v5, 0.0  ;;  %v782_v11 = vmul.f32 0.1, %v638_v5 }
  0xe3   : > { %vm671_vm10 = vcmp.gt.f32.partialorder %v521_v8, 0.0  ;;  %v735_v12 = vmul.f32 0.1, %v521_v8  ;;  %vm687_vm11 = vcmp.gt.f32.partialorder %v561_v9, 0.0  ;;  %v751_v13 = vmul.f32 0.1, %v561_v9 }
  0xe4   : > { %v830_v14 = vsel %vm702_vm8, %v598_v4, %v766_v10  ;;  %v846_v15 = vsel %vm718_vm9, %v638_v5, %v782_v11 }
  0xe5   : > { %895 = vst.msk [vmem:[%s1485_s4 + $0x128] sm:$0xff] %vm857_vm0, %v830_v14  ;;  %v799_v16 = vsel %vm671_vm10, %v521_v8, %v735_v12  ;;  %v815_v17 = vsel %vm687_vm11, %v561_v9, %v751_v13 }
  0xe6   : > { %911 = vst.msk [vmem:[%s1485_s4 + $0x1a8] sm:$0xff] %vm857_vm0, %v846_v15 }
  0xe7   : > { %864 = vst.msk [vmem:[%s1485_s4 + $0x30] sm:$0xff] %vm857_vm0, %v799_v16  ;;  %v600_v18 = vpop.f32.mrf.mxu2  ;;  %v640_v19 = vpop.f32.mrf.mxu3 }
  0xe8   : > { %880 = vst.msk [vmem:[%s1485_s4 + $0xb0] sm:$0xff] %vm857_vm0, %v815_v17  ;;  %v601_v20 = vadd.f32 %v1479_v40, %v600_v18  ;;  %v641_v21 = vadd.f32 %v1479_v40, %v640_v19  ;;  %v522_v22 = vpop.f32.mrf.mxu0  ;;  %v562_v23 = vpop.f32.mrf.mxu1 }
  0xe9   : > { %v523_v24 = vadd.f32 %v1479_v40, %v522_v22  ;;  %v563_v25 = vadd.f32 %v1479_v40, %v562_v23 }
  0xea   : > { %vm703_vm12 = vcmp.gt.f32.partialorder %v601_v20, 0.0  ;;  %v767_v26 = vmul.f32 0.1, %v601_v20  ;;  %vm719_vm13 = vcmp.gt.f32.partialorder %v641_v21, 0.0  ;;  %v783_v27 = vmul.f32 0.1, %v641_v21 }
  0xeb   : > { %vm672_vm14 = vcmp.gt.f32.partialorder %v523_v24, 0.0  ;;  %v736_v28 = vmul.f32 0.1, %v523_v24  ;;  %vm688_vm15 = vcmp.gt.f32.partialorder %v563_v25, 0.0  ;;  %v752_v29 = vmul.f32 0.1, %v563_v25 }
  0xec   : > { %v831_v30 = vsel %vm703_vm12, %v601_v20, %v767_v26  ;;  %v847_v31 = vsel %vm719_vm13, %v641_v21, %v783_v27 }
  0xed   : > { %896 = vst.msk [vmem:[%s1485_s4 + $0x130] sm:$0xff] %vm857_vm0, %v831_v30  ;;  %v800_v32 = vsel %vm672_vm14, %v523_v24, %v736_v28  ;;  %v816_v33 = vsel %vm688_vm15, %v563_v25, %v752_v29 }
  0xee   : > { %912 = vst.msk [vmem:[%s1485_s4 + $0x1b0] sm:$0xff] %vm857_vm0, %v847_v31 }
  0xef   : > { %865 = vst.msk [vmem:[%s1485_s4 + $0x38] sm:$0xff] %vm857_vm0, %v800_v32  ;;  %v602_v34 = vpop.f32.mrf.mxu2  ;;  %v642_v35 = vpop.f32.mrf.mxu3 }
  0xf0   : > { %881 = vst.msk [vmem:[%s1485_s4 + $0xb8] sm:$0xff] %vm857_vm0, %v816_v33  ;;  %v603_v36 = vadd.f32 %v1479_v40, %v602_v34  ;;  %v643_v37 = vadd.f32 %v1479_v40, %v642_v35  ;;  %v525_v38 = vpop.f32.mrf.mxu0  ;;  %v565_v39 = vpop.f32.mrf.mxu1 }
  0xf1   : > { %v526_v41 = vadd.f32 %v1479_v40, %v525_v38  ;;  %v566_v42 = vadd.f32 %v1479_v40, %v565_v39 }
  0xf2   : > { %vm704_vm1 = vcmp.gt.f32.partialorder %v603_v36, 0.0  ;;  %v768_v43 = vmul.f32 0.1, %v603_v36  ;;  %vm720_vm2 = vcmp.gt.f32.partialorder %v643_v37, 0.0  ;;  %v784_v44 = vmul.f32 0.1, %v643_v37 }
  0xf3   : > { %vm673_vm3 = vcmp.gt.f32.partialorder %v526_v41, 0.0  ;;  %v737_v45 = vmul.f32 0.1, %v526_v41  ;;  %vm689_vm4 = vcmp.gt.f32.partialorder %v566_v42, 0.0  ;;  %v753_v46 = vmul.f32 0.1, %v566_v42 }
  0xf4   : > { %v832_v47 = vsel %vm704_vm1, %v603_v36, %v768_v43  ;;  %v848_v48 = vsel %vm720_vm2, %v643_v37, %v784_v44 }
  0xf5   : > { %897 = vst.msk [vmem:[%s1485_s4 + $0x138] sm:$0xff] %vm857_vm0, %v832_v47  ;;  %v801_v49 = vsel %vm673_vm3, %v526_v41, %v737_v45  ;;  %v817_v50 = vsel %vm689_vm4, %v566_v42, %v753_v46 }
  0xf6   : > { %913 = vst.msk [vmem:[%s1485_s4 + $0x1b8] sm:$0xff] %vm857_vm0, %v848_v48 }
  0xf7   : > { %866 = vst.msk [vmem:[%s1485_s4 + $0x40] sm:$0xff] %vm857_vm0, %v801_v49  ;;  %v605_v51 = vpop.f32.mrf.mxu2  ;;  %v645_v52 = vpop.f32.mrf.mxu3 }
  0xf8   : > { %882 = vst.msk [vmem:[%s1485_s4 + $0xc0] sm:$0xff] %vm857_vm0, %v817_v50  ;;  %v606_v53 = vadd.f32 %v1479_v40, %v605_v51  ;;  %v646_v54 = vadd.f32 %v1479_v40, %v645_v52  ;;  %v527_v55 = vpop.f32.mrf.mxu0  ;;  %v567_v56 = vpop.f32.mrf.mxu1 }
  0xf9   : > { %v528_v57 = vadd.f32 %v1479_v40, %v527_v55  ;;  %v568_v58 = vadd.f32 %v1479_v40, %v567_v56 }
  0xfa   : > { %vm705_vm5 = vcmp.gt.f32.partialorder %v606_v53, 0.0  ;;  %v769_v59 = vmul.f32 0.1, %v606_v53  ;;  %vm721_vm6 = vcmp.gt.f32.partialorder %v646_v54, 0.0  ;;  %v785_v60 = vmul.f32 0.1, %v646_v54 }
  0xfb   : > { %vm674_vm7 = vcmp.gt.f32.partialorder %v528_v57, 0.0  ;;  %v738_v61 = vmul.f32 0.1, %v528_v57  ;;  %vm690_vm8 = vcmp.gt.f32.partialorder %v568_v58, 0.0  ;;  %v754_v62 = vmul.f32 0.1, %v568_v58 }
  0xfc   : > { %v833_v63 = vsel %vm705_vm5, %v606_v53, %v769_v59  ;;  %v849_v0 = vsel %vm721_vm6, %v646_v54, %v785_v60 }
  0xfd   : > { %898 = vst.msk [vmem:[%s1485_s4 + $0x140] sm:$0xff] %vm857_vm0, %v833_v63  ;;  %v802_v1 = vsel %vm674_vm7, %v528_v57, %v738_v61  ;;  %v818_v2 = vsel %vm690_vm8, %v568_v58, %v754_v62 }
  0xfe   : > { %914 = vst.msk [vmem:[%s1485_s4 + $0x1c0] sm:$0xff] %vm857_vm0, %v849_v0 }
  0xff   : > { %867 = vst.msk [vmem:[%s1485_s4 + $0x48] sm:$0xff] %vm857_vm0, %v802_v1  ;;  %v607_v3 = vpop.f32.mrf.mxu2  ;;  %v647_v4 = vpop.f32.mrf.mxu3 }
 0x100   : > { %883 = vst.msk [vmem:[%s1485_s4 + $0xc8] sm:$0xff] %vm857_vm0, %v818_v2  ;;  %v608_v5 = vadd.f32 %v1479_v40, %v607_v3  ;;  %v648_v6 = vadd.f32 %v1479_v40, %v647_v4  ;;  %v530_v7 = vpop.f32.mrf.mxu0  ;;  %v570_v8 = vpop.f32.mrf.mxu1 }
 0x101   : > { %v531_v9 = vadd.f32 %v1479_v40, %v530_v7  ;;  %v571_v10 = vadd.f32 %v1479_v40, %v570_v8 }
 0x102   : > { %vm706_vm9 = vcmp.gt.f32.partialorder %v608_v5, 0.0  ;;  %v770_v11 = vmul.f32 0.1, %v608_v5  ;;  %vm722_vm10 = vcmp.gt.f32.partialorder %v648_v6, 0.0  ;;  %v786_v12 = vmul.f32 0.1, %v648_v6 }
 0x103   : > { %vm675_vm11 = vcmp.gt.f32.partialorder %v531_v9, 0.0  ;;  %v739_v13 = vmul.f32 0.1, %v531_v9  ;;  %vm691_vm12 = vcmp.gt.f32.partialorder %v571_v10, 0.0  ;;  %v755_v14 = vmul.f32 0.1, %v571_v10 }
 0x104   : > { %v834_v15 = vsel %vm706_vm9, %v608_v5, %v770_v11  ;;  %v850_v16 = vsel %vm722_vm10, %v648_v6, %v786_v12 }
 0x105   : > { %899 = vst.msk [vmem:[%s1485_s4 + $0x148] sm:$0xff] %vm857_vm0, %v834_v15  ;;  %v803_v17 = vsel %vm675_vm11, %v531_v9, %v739_v13  ;;  %v819_v18 = vsel %vm691_vm12, %v571_v10, %v755_v14 }
 0x106   : > { %915 = vst.msk [vmem:[%s1485_s4 + $0x1c8] sm:$0xff] %vm857_vm0, %v850_v16 }
 0x107   : > { %868 = vst.msk [vmem:[%s1485_s4 + $0x50] sm:$0xff] %vm857_vm0, %v803_v17  ;;  %v610_v19 = vpop.f32.mrf.mxu2  ;;  %v650_v20 = vpop.f32.mrf.mxu3 }
 0x108   : > { %884 = vst.msk [vmem:[%s1485_s4 + $0xd0] sm:$0xff] %vm857_vm0, %v819_v18  ;;  %v611_v21 = vadd.f32 %v1479_v40, %v610_v19  ;;  %v651_v22 = vadd.f32 %v1479_v40, %v650_v20  ;;  %v532_v23 = vpop.f32.mrf.mxu0  ;;  %v572_v24 = vpop.f32.mrf.mxu1 }
 0x109   : > { %v533_v25 = vadd.f32 %v1479_v40, %v532_v23  ;;  %v573_v26 = vadd.f32 %v1479_v40, %v572_v24 }
 0x10a   : > { %vm707_vm13 = vcmp.gt.f32.partialorder %v611_v21, 0.0  ;;  %v771_v27 = vmul.f32 0.1, %v611_v21  ;;  %vm723_vm14 = vcmp.gt.f32.partialorder %v651_v22, 0.0  ;;  %v787_v28 = vmul.f32 0.1, %v651_v22 }
 0x10b   : > { %vm676_vm15 = vcmp.gt.f32.partialorder %v533_v25, 0.0  ;;  %v740_v29 = vmul.f32 0.1, %v533_v25  ;;  %vm692_vm1 = vcmp.gt.f32.partialorder %v573_v26, 0.0  ;;  %v756_v30 = vmul.f32 0.1, %v573_v26 }
 0x10c   : > { %v835_v31 = vsel %vm707_vm13, %v611_v21, %v771_v27  ;;  %v851_v32 = vsel %vm723_vm14, %v651_v22, %v787_v28 }
 0x10d   : > { %900 = vst.msk [vmem:[%s1485_s4 + $0x150] sm:$0xff] %vm857_vm0, %v835_v31  ;;  %v804_v33 = vsel %vm676_vm15, %v533_v25, %v740_v29  ;;  %v820_v34 = vsel %vm692_vm1, %v573_v26, %v756_v30 }
 0x10e   : > { %916 = vst.msk [vmem:[%s1485_s4 + $0x1d0] sm:$0xff] %vm857_vm0, %v851_v32 }
 0x10f   : > { %869 = vst.msk [vmem:[%s1485_s4 + $0x58] sm:$0xff] %vm857_vm0, %v804_v33  ;;  %v612_v35 = vpop.f32.mrf.mxu2  ;;  %v652_v36 = vpop.f32.mrf.mxu3 }
 0x110   : > { %885 = vst.msk [vmem:[%s1485_s4 + $0xd8] sm:$0xff] %vm857_vm0, %v820_v34  ;;  %v613_v37 = vadd.f32 %v1479_v40, %v612_v35  ;;  %v653_v38 = vadd.f32 %v1479_v40, %v652_v36  ;;  %v535_v39 = vpop.f32.mrf.mxu0  ;;  %v575_v41 = vpop.f32.mrf.mxu1 }
 0x111   : > { %v536_v42 = vadd.f32 %v1479_v40, %v535_v39  ;;  %v576_v43 = vadd.f32 %v1479_v40, %v575_v41 }
 0x112   : > { %vm708_vm2 = vcmp.gt.f32.partialorder %v613_v37, 0.0  ;;  %v772_v44 = vmul.f32 0.1, %v613_v37  ;;  %vm724_vm3 = vcmp.gt.f32.partialorder %v653_v38, 0.0  ;;  %v788_v45 = vmul.f32 0.1, %v653_v38 }
 0x113   : > { %vm677_vm4 = vcmp.gt.f32.partialorder %v536_v42, 0.0  ;;  %v741_v46 = vmul.f32 0.1, %v536_v42  ;;  %vm693_vm5 = vcmp.gt.f32.partialorder %v576_v43, 0.0  ;;  %v757_v47 = vmul.f32 0.1, %v576_v43 }
 0x114   : > { %v836_v48 = vsel %vm708_vm2, %v613_v37, %v772_v44  ;;  %v852_v49 = vsel %vm724_vm3, %v653_v38, %v788_v45 }
 0x115   : > { %901 = vst.msk [vmem:[%s1485_s4 + $0x158] sm:$0xff] %vm857_vm0, %v836_v48  ;;  %v805_v50 = vsel %vm677_vm4, %v536_v42, %v741_v46  ;;  %v821_v51 = vsel %vm693_vm5, %v576_v43, %v757_v47 }
 0x116   : > { %917 = vst.msk [vmem:[%s1485_s4 + $0x1d8] sm:$0xff] %vm857_vm0, %v852_v49 }
 0x117   : > { %870 = vst.msk [vmem:[%s1485_s4 + $0x60] sm:$0xff] %vm857_vm0, %v805_v50  ;;  %v615_v52 = vpop.f32.mrf.mxu2  ;;  %v655_v53 = vpop.f32.mrf.mxu3 }
 0x118   : > { %886 = vst.msk [vmem:[%s1485_s4 + $0xe0] sm:$0xff] %vm857_vm0, %v821_v51  ;;  %v616_v54 = vadd.f32 %v1479_v40, %v615_v52  ;;  %v656_v55 = vadd.f32 %v1479_v40, %v655_v53  ;;  %v537_v56 = vpop.f32.mrf.mxu0  ;;  %v577_v57 = vpop.f32.mrf.mxu1 }
 0x119   : > { %v538_v58 = vadd.f32 %v1479_v40, %v537_v56  ;;  %v578_v59 = vadd.f32 %v1479_v40, %v577_v57 }
 0x11a   : > { %vm709_vm6 = vcmp.gt.f32.partialorder %v616_v54, 0.0  ;;  %v773_v60 = vmul.f32 0.1, %v616_v54  ;;  %vm725_vm7 = vcmp.gt.f32.partialorder %v656_v55, 0.0  ;;  %v789_v61 = vmul.f32 0.1, %v656_v55 }
 0x11b   : > { %vm678_vm8 = vcmp.gt.f32.partialorder %v538_v58, 0.0  ;;  %v742_v62 = vmul.f32 0.1, %v538_v58  ;;  %vm694_vm9 = vcmp.gt.f32.partialorder %v578_v59, 0.0  ;;  %v758_v63 = vmul.f32 0.1, %v578_v59 }
 0x11c   : > { %v837_v0 = vsel %vm709_vm6, %v616_v54, %v773_v60  ;;  %v853_v1 = vsel %vm725_vm7, %v656_v55, %v789_v61 }
 0x11d   : > { %902 = vst.msk [vmem:[%s1485_s4 + $0x160] sm:$0xff] %vm857_vm0, %v837_v0  ;;  %v806_v2 = vsel %vm678_vm8, %v538_v58, %v742_v62  ;;  %v822_v3 = vsel %vm694_vm9, %v578_v59, %v758_v63 }
 0x11e   : > { %918 = vst.msk [vmem:[%s1485_s4 + $0x1e0] sm:$0xff] %vm857_vm0, %v853_v1 }
 0x11f   : > { %871 = vst.msk [vmem:[%s1485_s4 + $0x68] sm:$0xff] %vm857_vm0, %v806_v2  ;;  %v617_v4 = vpop.f32.mrf.mxu2  ;;  %v657_v5 = vpop.f32.mrf.mxu3 }
 0x120   : > { %887 = vst.msk [vmem:[%s1485_s4 + $0xe8] sm:$0xff] %vm857_vm0, %v822_v3  ;;  %v618_v6 = vadd.f32 %v1479_v40, %v617_v4  ;;  %v658_v7 = vadd.f32 %v1479_v40, %v657_v5  ;;  %v540_v8 = vpop.f32.mrf.mxu0  ;;  %v580_v9 = vpop.f32.mrf.mxu1 }
 0x121   : > { %v541_v10 = vadd.f32 %v1479_v40, %v540_v8  ;;  %v581_v11 = vadd.f32 %v1479_v40, %v580_v9 }
 0x122   : > { %vm710_vm10 = vcmp.gt.f32.partialorder %v618_v6, 0.0  ;;  %v774_v12 = vmul.f32 0.1, %v618_v6  ;;  %vm726_vm11 = vcmp.gt.f32.partialorder %v658_v7, 0.0  ;;  %v790_v13 = vmul.f32 0.1, %v658_v7 }
 0x123   : > { %vm679_vm12 = vcmp.gt.f32.partialorder %v541_v10, 0.0  ;;  %v743_v14 = vmul.f32 0.1, %v541_v10  ;;  %vm695_vm13 = vcmp.gt.f32.partialorder %v581_v11, 0.0  ;;  %v759_v15 = vmul.f32 0.1, %v581_v11 }
 0x124   : > { %v838_v16 = vsel %vm710_vm10, %v618_v6, %v774_v12  ;;  %v854_v17 = vsel %vm726_vm11, %v658_v7, %v790_v13 }
 0x125   : > { %903 = vst.msk [vmem:[%s1485_s4 + $0x168] sm:$0xff] %vm857_vm0, %v838_v16  ;;  %v807_v18 = vsel %vm679_vm12, %v541_v10, %v743_v14  ;;  %v823_v19 = vsel %vm695_vm13, %v581_v11, %v759_v15 }
 0x126   : > { %919 = vst.msk [vmem:[%s1485_s4 + $0x1e8] sm:$0xff] %vm857_vm0, %v854_v17 }
 0x127   : > { %872 = vst.msk [vmem:[%s1485_s4 + $0x70] sm:$0xff] %vm857_vm0, %v807_v18  ;;  %v620_v20 = vpop.f32.mrf.mxu2  ;;  %v660_v21 = vpop.f32.mrf.mxu3 }
 0x128   : > { %888 = vst.msk [vmem:[%s1485_s4 + $0xf0] sm:$0xff] %vm857_vm0, %v823_v19  ;;  %v621_v22 = vadd.f32 %v1479_v40, %v620_v20  ;;  %v661_v23 = vadd.f32 %v1479_v40, %v660_v21  ;;  %v542_v24 = vpop.f32.mrf.mxu0  ;;  %v582_v25 = vpop.f32.mrf.mxu1 }
 0x129   : > { %v543_v26 = vadd.f32 %v1479_v40, %v542_v24  ;;  %v583_v27 = vadd.f32 %v1479_v40, %v582_v25 }
 0x12a   : > { %vm711_vm14 = vcmp.gt.f32.partialorder %v621_v22, 0.0  ;;  %v775_v28 = vmul.f32 0.1, %v621_v22  ;;  %vm727_vm15 = vcmp.gt.f32.partialorder %v661_v23, 0.0  ;;  %v791_v29 = vmul.f32 0.1, %v661_v23 }
 0x12b   : > { %vm680_vm1 = vcmp.gt.f32.partialorder %v543_v26, 0.0  ;;  %v744_v30 = vmul.f32 0.1, %v543_v26  ;;  %vm696_vm2 = vcmp.gt.f32.partialorder %v583_v27, 0.0  ;;  %v760_v31 = vmul.f32 0.1, %v583_v27 }
 0x12c   : > { %v839_v32 = vsel %vm711_vm14, %v621_v22, %v775_v28  ;;  %v855_v33 = vsel %vm727_vm15, %v661_v23, %v791_v29 }
 0x12d   : > { %904 = vst.msk [vmem:[%s1485_s4 + $0x170] sm:$0xff] %vm857_vm0, %v839_v32  ;;  %v808_v34 = vsel %vm680_vm1, %v543_v26, %v744_v30  ;;  %v824_v35 = vsel %vm696_vm2, %v583_v27, %v760_v31 }
 0x12e   : > { %920 = vst.msk [vmem:[%s1485_s4 + $0x1f0] sm:$0xff] %vm857_vm0, %v855_v33 }
 0x12f   : > { %873 = vst.msk [vmem:[%s1485_s4 + $0x78] sm:$0xff] %vm857_vm0, %v808_v34  ;;  %v622_v36 = vpop.f32.mrf.mxu2  ;;  %v662_v37 = vpop.f32.mrf.mxu3 }
 0x130   : > { %889 = vst.msk [vmem:[%s1485_s4 + $0xf8] sm:$0xff] %vm857_vm0, %v824_v35  ;;  %v623_v38 = vadd.f32 %v1479_v40, %v622_v36  ;;  %v663_v39 = vadd.f32 %v1479_v40, %v662_v37 }
 0x132   : > { %vm712_vm3 = vcmp.gt.f32.partialorder %v623_v38, 0.0  ;;  %v776_v41 = vmul.f32 0.1, %v623_v38  ;;  %vm728_vm4 = vcmp.gt.f32.partialorder %v663_v39, 0.0  ;;  %v792_v42 = vmul.f32 0.1, %v663_v39 }
 0x134   : > { %v840_v43 = vsel %vm712_vm3, %v623_v38, %v776_v41  ;;  %v856_v44 = vsel %vm728_vm4, %v663_v39, %v792_v42 }
 0x135   : > { %905 = vst.msk [vmem:[%s1485_s4 + $0x178] sm:$0xff] %vm857_vm0, %v840_v43 }
 0x136   : > { %921 = vst.msk [vmem:[%s1485_s4 + $0x1f8] sm:$0xff] %vm857_vm0, %v856_v44 }
 0x137   : > { %1306 = shalt.err (!%p1303_p3)
}
 0x138   : > { %s1343_s27 = smov 128   ;;  %s1344_s28 = smov 8  }
 0x139   : > { %1237 = dma.vmem_to_hbm [thread:$0]  (%p1403_p5), %s936_s8, 8192, %s938_s9, %s923_s10, %s1343_s27, %s1343_s27, %s1344_s28  }
 0x13a PF: > { %p1243_p4 = scmp.ge.s32.totalorder %s1341_s15, 2  ;;  %s952_s29 = sand.u32 1, %s1329_s12  }
 0x13b   : > { %s953_s30 = scalar_lea.sflag [#allocation3], %s952_s29 }
 0x13c   : > { %p1240_p7 = pnand %p1243_p4, %p1407_p6 }
 0x13e   : > { %p1241_p8 = pneg %p1240_p7 }
 0x140   : > { %1324 = dma.done.wait (%p1241_p8), %s953_s30, 8192  }
 0x141   : > { %1326 = vsyncadd (%p1241_p8), %s953_s30, 4294959104  ;;  %p13_p9 = scmp.ge.s32.totalorder %s1390_s18, 4   ;;  %s1717_s12 = smov %s1333_s13 }
 0x142   : > { %s1718_s13 = smov %s1337_s14  ;;  %s1719_s14 = smov %s1401_s21 }
 0x143   : > { %s1720_s15 = smov %s1390_s18  ;;  %15 = sbr.rel (!%p13_p9) target bundleno = 3 (0x3), region = 67 }
 0x148   :  { %959 = vsyncpa [#allocation3], 1 }
 0x149   :  { %961 = vsyncpa [#allocation3 + $0x1], 1 }

</bundles_post_ra>
